<compile_context>
chip_gen: v6e
topology: v6e:2x2x1
jax: 0.10.0
libtpu: 0.0.40
codegen_flags: <defaults>
</compile_context>

<pallas_src>
import functools

import jax
import jax.numpy as jnp
from jax.experimental import pallas as pl
from jax.experimental.pallas import tpu as pltpu

_LANE = 128
_VMEM_BUDGET = 48 * 1024 * 1024      # per-TC working-set target (v7x-safe)
_VMEM_LIMIT_CAP = 56 * 1024 * 1024   # never ask for more scoped VMEM than this


def _round_up(x, n):
    return ((x + n - 1) // n) * n


def make_embedding_kernel(block_seq, d_pad, m_pad, beta, compute_dtype):
    beta = float(beta)

    def kernel(t_ref, mk_ref, wm_ref, wt_ref, bt_ref, o_ref):
        t_val = t_ref[...]                                   # (TS, 1) f32
        mk = mk_ref[...]                                     # (TS, 1) i32
        # One-hot (TS, m_pad) built in-register: column index == marker.
        col = jax.lax.broadcasted_iota(jnp.int32, (block_seq, m_pad), 1)
        one_hot = (col == mk).astype(compute_dtype)
        # Marker embedding on the MXU: W_m is pre-transposed to (m_pad, d_pad),
        # so this is a plain (TS, K) x (K, N) matmul — no in-kernel transpose.
        emb = jax.lax.dot_general(
            one_hot, wm_ref[...],
            dimension_numbers=(((1,), (0,)), ((), ())),
            preferred_element_type=jnp.float32)
        # Time embedding: (1, d_pad) * (TS, 1) + (1, d_pad) -> (TS, d_pad).
        time_emb = wt_ref[...] * t_val + bt_ref[...]
        out = beta * emb + (1.0 - beta) * time_emb
        # Rows with t < 0 become zeros (matches the torch.zeros branch).
        o_ref[...] = jnp.where(t_val >= 0.0, out, 0.0).astype(o_ref.dtype)

    return kernel


def prepare_embedding_params(W_m, W_t, b_t, compute_dtype=jnp.float32):
    """Pad + pre-transpose the parameters ONCE.

    Store / carry the returned arrays; this keeps the per-call forward path
    free of the full-table HBM pad/transpose pass flagged in the perf review.
    """
    d_model, m = W_m.shape
    assert m < (1 << 24), "marker ids ride in x as f32; need m < 2**24 for exactness"
    d_pad = _round_up(d_model, _LANE)
    m_pad = _round_up(m, _LANE)
    # (m_pad, d_pad): plain-matmul layout in the kernel, and the row-major
    # layout a future scalar-prefetch gather path wants.
    wm_t = jnp.pad(W_m.T.astype(compute_dtype),
                   ((0, m_pad - m), (0, d_pad - d_model)))
    wt = jnp.pad(W_t.astype(jnp.float32), (0, d_pad - d_model)).reshape(1, d_pad)
    bt = jnp.pad(b_t.astype(jnp.float32), (0, d_pad - d_model)).reshape(1, d_pad)
    return wm_t, wt, bt


def _footprint_bytes(ts, d_pad, m_pad, w_itemsize, out_itemsize):
    return (2 * m_pad * d_pad * w_itemsize      # resident table, double-buffered
            + 2 * ts * d_pad * out_itemsize     # output tile, double-buffered
            + ts * m_pad * w_itemsize           # one-hot temporary
            + ts * d_pad * 4                    # f32 accum of the blend
            + 4 * ts * 8)                       # t / marker tiles


def _pick_seq_tile(seq_len, d_pad, m_pad, w_itemsize, out_itemsize):
    full = _round_up(seq_len, 8)
    if full <= 256:
        cands = [full]
    else:
        # Multiples of 256 fill the v6e/v7x MXU M dimension and amortize the
        # ~0.35 us per-grid-step overhead; try the biggest tile that fits.
        cands = [c for c in (1024, 768, 512, 256) if c <= _round_up(full, 256)]
    for ts in cands:
        fp = _footprint_bytes(ts, d_pad, m_pad, w_itemsize, out_itemsize)
        if fp <= _VMEM_BUDGET:
            return ts, fp
    ts = cands[-1]
    return ts, _footprint_bytes(ts, d_pad, m_pad, w_itemsize, out_itemsize)


@functools.partial(jax.jit,
                   static_argnames=("d_model", "beta", "block_seq", "out_dtype"))
def embedding_forward_prepared(x, wm_t, wt, bt, *, d_model, beta,
                               block_seq=None, out_dtype=jnp.float32):
    """x: (seq_len, 2) float array; wm_t/wt/bt from prepare_embedding_params."""
    seq_len = x.shape[0]
    m_pad, d_pad = wm_t.shape
    w_itemsize = jnp.dtype(wm_t.dtype).itemsize
    out_itemsize = jnp.dtype(out_dtype).itemsize

    if block_seq is None:
        ts, footprint = _pick_seq_tile(seq_len, d_pad, m_pad,
                                       w_itemsize, out_itemsize)
    else:
        ts = min(block_seq, _round_up(seq_len, 8))
        footprint = _footprint_bytes(ts, d_pad, m_pad, w_itemsize, out_itemsize)
    s_pad = _round_up(seq_len, ts)

    t = x[:, 0].astype(jnp.float32)
    marker = x[:, 1].astype(jnp.int32)
    # Pad the sequence with t = -1 rows: they hit the zero branch and are
    # sliced off below; padded markers are 0 (unused).
    t = jnp.pad(t, (0, s_pad - seq_len), constant_values=-1.0).reshape(s_pad, 1)
    marker = jnp.pad(marker, (0, s_pad - seq_len)).reshape(s_pad, 1)

    kernel = make_embedding_kernel(ts, d_pad, m_pad, beta, wm_t.dtype)

    vmem_limit = int(min(max(2 * footprint, 32 * 1024 * 1024), _VMEM_LIMIT_CAP))
    bytes_accessed = int(
        s_pad * 8                             # t + marker
        + s_pad * d_pad * out_itemsize        # output
        + m_pad * d_pad * w_itemsize          # weight table (resident)
        + 2 * d_pad * 4)                      # W_t, b_t

    out = pl.pallas_call(
        kernel,
        out_shape=jax.ShapeDtypeStruct((s_pad, d_pad), out_dtype),
        grid=(s_pad // ts,),
        in_specs=[
            pl.BlockSpec((ts, 1), lambda i: (i, 0)),          # t tile
            pl.BlockSpec((ts, 1), lambda i: (i, 0)),          # marker tile
            pl.BlockSpec((m_pad, d_pad), lambda i: (0, 0)),   # W_m^T (resident)
            pl.BlockSpec((1, d_pad), lambda i: (0, 0)),       # W_t (resident)
            pl.BlockSpec((1, d_pad), lambda i: (0, 0)),       # b_t (resident)
        ],
        out_specs=pl.BlockSpec((ts, d_pad), lambda i: (i, 0)),
        compiler_params=pltpu.CompilerParams(
            dimension_semantics=("parallel",),
            vmem_limit_bytes=vmem_limit,
        ),
        cost_estimate=pl.CostEstimate(
            flops=2 * s_pad * m_pad * d_pad,
            transcendentals=0,
            bytes_accessed=bytes_accessed,
        ),
    )(t, marker, wm_t, wt, bt)

    return out[:seq_len, :d_model]


def embedding_forward(x, W_m, W_t, b_t, beta, *, compute_dtype=jnp.float32,
                      out_dtype=jnp.float32, block_seq=None):
    """Convenience path: pads/transposes per call. Prefer preparing once."""
    wm_t, wt, bt = prepare_embedding_params(W_m, W_t, b_t, compute_dtype)
    return embedding_forward_prepared(x, wm_t, wt, bt, d_model=W_m.shape[0],
                                      beta=float(beta), block_seq=block_seq,
                                      out_dtype=out_dtype)


def embedding_reference(x, W_m, W_t, b_t, beta):
    """Pure-JAX reference matching the PyTorch loop semantics."""
    t = x[:, 0].astype(jnp.float32)            # (S,)
    marker = x[:, 1].astype(jnp.int32)         # (S,)
    emb = W_m.T[marker]                        # (S, d_model)
    time_emb = W_t[None, :] * t[:, None] + b_t[None, :]
    out = beta * emb + (1.0 - beta) * time_emb
    return jnp.where(t[:, None] >= 0.0, out, 0.0)


if __name__ == "__main__":
    key = jax.random.PRNGKey(0)
    k1, k2, k3, k4, k5 = jax.random.split(key, 5)

    d_model = 32
    m = 16
    seq_len = 8
    beta = 0.5

    # Deterministic parameter init (same shapes as the nn.Parameters).
    W_m = jax.random.normal(k1, (d_model, m), dtype=jnp.float32)
    W_t = jax.random.normal(k2, (d_model,), dtype=jnp.float32)
    b_t = jax.random.normal(k3, (d_model,), dtype=jnp.float32)

    # Input: (seq_len, 2) = [t, marker]; include negative t to exercise the
    # zero-row branch. Marker ids ride in x as floats (exact for ids < 2^24).
    t_vals = jax.random.uniform(k4, (seq_len,), minval=-0.5, maxval=2.0)
    markers = jax.random.randint(k5, (seq_len,), 0, m).astype(jnp.float32)
    x = jnp.stack([t_vals, markers], axis=1)   # (seq_len, 2)

    # Pad/transpose the weights once (hoisted out of the forward path), then
    # run the pipelined kernel.
    wm_t, wt, bt = prepare_embedding_params(W_m, W_t, b_t)
    out = embedding_forward_prepared(x, wm_t, wt, bt, d_model=d_model, beta=beta)
    out = jax.block_until_ready(out)

    ref = embedding_reference(x, W_m, W_t, b_t, beta)
    assert out.shape == (seq_len, d_model)
    assert jnp.allclose(out, ref, atol=1e-5, rtol=1e-5), "mismatch vs reference"

    print("KERNEL_OK")
</pallas_src>

<mosaic_0001>
module attributes {stable_mosaic.version = 11 : i64} {
  func.func @kernel(%arg0: i32, %arg1: memref<8x1xf32, #tpu.memory_space<vmem>>, %arg2: memref<8x1xi32, #tpu.memory_space<vmem>>, %arg3: memref<128x128xf32, #tpu.memory_space<vmem>>, %arg4: memref<1x128xf32, #tpu.memory_space<vmem>>, %arg5: memref<1x128xf32, #tpu.memory_space<vmem>>, %arg6: memref<8x128xf32, #tpu.memory_space<vmem>>) attributes {dimension_semantics = [#tpu.dimension_semantics<parallel>], iteration_bounds = array<i64: 1>, scalar_prefetch = 0 : i64, scratch_operands = 0 : i64, tpu.core_type = #tpu.core_type<tc>, window_params = [{transform_indices = @transform_0, window_bounds = array<i64: 8, 1>}, {transform_indices = @transform_1, window_bounds = array<i64: 8, 1>}, {pipeline_mode = #tpu.pipeline_mode<synchronous>, transform_indices = @transform_2, window_bounds = array<i64: 128, 128>}, {pipeline_mode = #tpu.pipeline_mode<synchronous>, transform_indices = @transform_3, window_bounds = array<i64: 1, 128>}, {pipeline_mode = #tpu.pipeline_mode<synchronous>, transform_indices = @transform_4, window_bounds = array<i64: 1, 128>}, {transform_indices = @transform_5, window_bounds = array<i64: 8, 128>}]} {
    %c0 = arith.constant 0 : index
    %c0_0 = arith.constant 0 : index
    %0 = vector.load %arg1[%c0, %c0_0] : memref<8x1xf32, #tpu.memory_space<vmem>>, vector<8x1xf32>
    %c0_1 = arith.constant 0 : index
    %c0_2 = arith.constant 0 : index
    %1 = vector.load %arg2[%c0_1, %c0_2] : memref<8x1xi32, #tpu.memory_space<vmem>>, vector<8x1xi32>
    %2 = tpu.iota {dimensions = array<i32: 1>} : vector<8x128xi32>
    %3 = vector.broadcast %1 : vector<8x1xi32> to vector<8x128xi32>
    %4 = arith.cmpi eq, %2, %3 : vector<8x128xi32>
    %5 = arith.extui %4 : vector<8x128xi1> to vector<8x128xi32>
    %6 = arith.sitofp %5 : vector<8x128xi32> to vector<8x128xf32>
    %c0_3 = arith.constant 0 : index
    %c0_4 = arith.constant 0 : index
    %7 = vector.load %arg3[%c0_3, %c0_4] : memref<128x128xf32, #tpu.memory_space<vmem>>, vector<128x128xf32>
    %cst = arith.constant dense<0.000000e+00> : vector<8x128xf32>
    %8 = tpu.matmul %6, %7, %cst {dimension_numbers = #tpu.dot_dimension_numbers<[1], [0], [0], [1], [0, 0, 1, 1], [], []>} : vector<8x128xf32>, vector<128x128xf32>, vector<8x128xf32> -> vector<8x128xf32>
    %c0_5 = arith.constant 0 : index
    %c0_6 = arith.constant 0 : index
    %9 = vector.load %arg4[%c0_5, %c0_6] : memref<1x128xf32, #tpu.memory_space<vmem>>, vector<1x128xf32>
    %10 = vector.broadcast %9 : vector<1x128xf32> to vector<8x128xf32>
    %11 = vector.broadcast %0 : vector<8x1xf32> to vector<8x128xf32>
    %12 = arith.mulf %10, %11 : vector<8x128xf32>
    %c0_7 = arith.constant 0 : index
    %c0_8 = arith.constant 0 : index
    %13 = vector.load %arg5[%c0_7, %c0_8] : memref<1x128xf32, #tpu.memory_space<vmem>>, vector<1x128xf32>
    %14 = vector.broadcast %13 : vector<1x128xf32> to vector<8x128xf32>
    %15 = arith.addf %12, %14 : vector<8x128xf32>
    %cst_9 = arith.constant 5.000000e-01 : f32
    %16 = vector.broadcast %cst_9 : f32 to vector<8x128xf32>
    %17 = arith.mulf %16, %8 : vector<8x128xf32>
    %cst_10 = arith.constant 5.000000e-01 : f32
    %18 = vector.broadcast %cst_10 : f32 to vector<8x128xf32>
    %19 = arith.mulf %18, %15 : vector<8x128xf32>
    %20 = arith.addf %17, %19 : vector<8x128xf32>
    %cst_11 = arith.constant 0.000000e+00 : f32
    %21 = vector.broadcast %cst_11 : f32 to vector<8x1xf32>
    %22 = arith.cmpf oge, %0, %21 : vector<8x1xf32>
    %cst_12 = arith.constant 0.000000e+00 : f32
    %23 = vector.shape_cast %22 : vector<8x1xi1> to vector<8x1xi1>
    %24 = vector.broadcast %23 : vector<8x1xi1> to vector<8x128xi1>
    %25 = vector.broadcast %cst_12 : f32 to vector<8x128xf32>
    %26 = arith.select %24, %20, %25 : vector<8x128xi1>, vector<8x128xf32>
    %c0_13 = arith.constant 0 : index
    %c0_14 = arith.constant 0 : index
    %27 = vector.load %arg6[%c0_13, %c0_14] : memref<8x128xf32, #tpu.memory_space<vmem>>, vector<8x128xf32>
    tpu.vector_store %arg6[%c0_13, %c0_14], %26 {strides = array<i32>} : memref<8x128xf32, #tpu.memory_space<vmem>>, vector<8x128xf32>,
    return
  }
  func.func @transform_0(%arg0: i32) -> (i32, i32) {
    %c0_i32 = arith.constant 0 : i32
    %c0_i32_0 = arith.constant 0 : i32
    return %arg0, %c0_i32 : i32, i32
  }
  func.func @transform_1(%arg0: i32) -> (i32, i32) {
    %c0_i32 = arith.constant 0 : i32
    %c0_i32_0 = arith.constant 0 : i32
    return %arg0, %c0_i32 : i32, i32
  }
  func.func @transform_2(%arg0: i32) -> (i32, i32) {
    %c0_i32 = arith.constant 0 : i32
    %c0_i32_0 = arith.constant 0 : i32
    %c0_i32_1 = arith.constant 0 : i32
    return %c0_i32, %c0_i32_0 : i32, i32
  }
  func.func @transform_3(%arg0: i32) -> (i32, i32) {
    %c0_i32 = arith.constant 0 : i32
    %c0_i32_0 = arith.constant 0 : i32
    %c0_i32_1 = arith.constant 0 : i32
    return %c0_i32, %c0_i32_0 : i32, i32
  }
  func.func @transform_4(%arg0: i32) -> (i32, i32) {
    %c0_i32 = arith.constant 0 : i32
    %c0_i32_0 = arith.constant 0 : i32
    %c0_i32_1 = arith.constant 0 : i32
    return %c0_i32, %c0_i32_0 : i32, i32
  }
  func.func @transform_5(%arg0: i32) -> (i32, i32) {
    %c0_i32 = arith.constant 0 : i32
    %c0_i32_0 = arith.constant 0 : i32
    return %arg0, %c0_i32 : i32, i32
  }
}

</mosaic_0001>

<bundles_post_ra>
// kernel: embedding_forward_prepared.1
= control target key start
LH: loop header
LB: loop body
LE: loop exit
PB: predicated region body
PF: predicated region fallthrough
CT: control target
= control target key end

     0   :  { %10 = vsyncpa [#allocation3], 0  ;;  %s344_s0 = inlined_call_operand.vmem [shape: f32[8,1], index: 0, kind: input, shape index: {}]   ;;  %s345_s1 = inlined_call_operand.vmem [shape: s32[8,1], index: 1, kind: input, shape index: {}]   ;;  %s346_s2 = inlined_call_operand.hbm [shape: f32[128,128], index: 2, kind: input, shape index: {}]   ;;  %s347_s3 = inlined_call_operand.vmem [shape: f32[1,128], index: 3, kind: input, shape index: {}]   ;;  %s348_s4 = inlined_call_operand.vmem [shape: f32[1,128], index: 4, kind: input, shape index: {}]   ;;  %s349_s5 = inlined_call_operand.hbm [shape: f32[8,128], index: 5, kind: output, shape index: {}]  }
   0x1   :  { %11 = vsyncpa [#allocation4], 0  ;;  %s288_s18 = smov [#allocation2]  }
   0x2   :  { %s21_s19 = sshll.u32 %s288_s18, 4  ;;  %s22_s19 = int_to_ptr.vmem [resolvable:$true] %s21_s19 }
   0x3   :  { %s252_s20 = scalar_lea.vmem %s22_s19, 2048  ;;  %p257_p1 = scmp.lt.s32.totalorder %s22_s19, %s22_s19 }
   0x4   :  { %p253_p0 = scmp.ne.s32.totalorder %s22_s19, %s252_s20  ;;  %p258_p2 = scmp.lt.s32.totalorder %s252_s20, %s252_s20 }
   0x6   :  { %p259_p3 = por %p258_p2, %p257_p1 }
   0x8   :  { %p260_p4 = pnand %p259_p3, %p253_p0 }
   0xa   :  { %263 = shalt.err (!%p260_p4)
}
   0xb   :  { %s289_s21 = smov 128   ;;  %s290_s22 = smov 8  }
   0xc   :  { %27 = dma.hbm_to_vmem [thread:$0]  %s346_s2, 2048, %s22_s19, [#allocation3], %s289_s21, %s289_s21, %s290_s22  }
   0xd   :  { %284 = dma.done.wait [#allocation3], 2048  }
   0xe   :  { %285 = vsyncadd [#allocation3], 4294965248  ;;  %v291_v0 = vmov 0   ;;  %v292_v1 = vmov 0.0   ;;  %vm293_vm0 = vmmov 0   ;;  %v36_v2 = vld [vmem:[%s345_s1] sm:$0xff]  ;;  %v37_v21 = vlaneseq }
   0xf   :  { %242 = vset.pattern.permute.xlu0 %v291_v0  ;;  %199 = vmatprep.subr.mxu0 %v292_v1  ;;  %v60_v3 = vld [vmem:[#allocation2 + $0x78] sm:$0xff]  ;;  %v59_v4 = vld [vmem:[#allocation2 + $0x70] sm:$0xff]  ;;  %v35_v5 = vld [vmem:[%s344_s0] sm:$0xff]  ;;  %v294_v24 = vmov 1.0   ;;  %s295_s30 = smov [#allocation5]  }
  0x10   :  { %243 = vset.pattern.permute.xlu1 %v291_v0  ;;  %231 = vmatprep.mubr.msk.f32.mxu0 %vm293_vm0, %v292_v1  ;;  %v58_v6 = vld [vmem:[#allocation2 + $0x68] sm:$0xff]  ;;  %v57_v7 = vld [vmem:[#allocation2 + $0x60] sm:$0xff]  ;;  %vm155_vm1 = vcmp.ge.f32.partialorder %v35_v5, 0.0  ;;  %v56_v8 = vld [vmem:[#allocation2 + $0x58] sm:$0xff]  ;;  %v38_v22 = vand.u32 127, %v37_v21  ;;  %s169_s6 = sshll.u32 %s295_s30, 4  ;;  %s170_s6 = int_to_ptr.vmem [resolvable:$true] %s169_s6 }
  0x11   :  { %40 = vperm.xlu0 %242, %v36_v2   ;;  %200 = vmatpush3.msra.mxu0 %v60_v3  ;;  %v156_v9 = vsel %vm155_vm1, 1, %v291_v0  ;;  %v55_v10 = vld [vmem:[#allocation2 + $0x50] sm:$0xff]  ;;  %v54_v11 = vld [vmem:[#allocation2 + $0x48] sm:$0xff]  ;;  %v53_v12 = vld [vmem:[#allocation2 + $0x40] sm:$0xff]  ;;  %p269_p6 = scmp.lt.s32.totalorder %s170_s6, %s170_s6 }
  0x12   :  { %201 = vmatprep.subr.mxu0 %v292_v1  ;;  %158 = vperm.xlu1 %243, %v156_v9   ;;  %v52_v13 = vld [vmem:[#allocation2 + $0x38] sm:$0xff]  ;;  %v51_v14 = vld [vmem:[#allocation2 + $0x30] sm:$0xff]  ;;  %v50_v15 = vld [vmem:[#allocation2 + $0x28] sm:$0xff] }
  0x13   :  { %202 = vmatpush3.msra.mxu0 %v59_v4  ;;  %v49_v16 = vld [vmem:[#allocation2 + $0x20] sm:$0xff]  ;;  %v48_v17 = vld [vmem:[#allocation2 + $0x18] sm:$0xff]  ;;  %v47_v18 = vld [vmem:[#allocation2 + $0x10] sm:$0xff] }
  0x14   :  { %203 = vmatprep.subr.mxu0 %v292_v1  ;;  %v46_v19 = vld [vmem:[#allocation2 + $0x8] sm:$0xff]  ;;  %v45_v20 = vld [vmem:[#allocation2] sm:$0xff] }
  0x15   :  { %140 = vperm.xlu0 %242, %v35_v5   ;;  %204 = vmatpush3.msra.mxu0 %v58_v6  ;;  %v180_v25 = vld [vmem:[%s347_s3] ss:$0 sm:$0xff]  ;;  %s264_s3 = scalar_lea.vmem %s170_s6, 128 }
  0x16   :  { %205 = vmatprep.subr.mxu0 %v292_v1  ;;  %v181_v28 = vld [vmem:[%s348_s4] ss:$0 sm:$0xff]  ;;  %p265_p5 = scmp.ne.s32.totalorder %s170_s6, %s264_s3  ;;  %p270_p7 = scmp.lt.s32.totalorder %s264_s3, %s264_s3 }
  0x17   :  { %206 = vmatpush3.msra.mxu0 %v57_v7 }
  0x18   :  { %207 = vmatprep.subr.mxu0 %v292_v1  ;;  %p271_p8 = por %p270_p7, %p269_p6 }
  0x19   :  { %208 = vmatpush3.msra.mxu0 %v56_v8 }
  0x1a   :  { %209 = vmatprep.subr.mxu0 %v292_v1  ;;  %p272_p9 = pnand %p271_p8, %p265_p5 }
  0x1b   :  { %210 = vmatpush3.msra.mxu0 %v55_v10 }
  0x1c   :  { %211 = vmatprep.subr.mxu0 %v292_v1 }
  0x1d   :  { %212 = vmatpush3.msra.mxu0 %v54_v11 }
  0x1e   :  { %213 = vmatprep.subr.mxu0 %v292_v1 }
  0x1f   :  { %214 = vmatpush3.msra.mxu0 %v53_v12 }
  0x20   :  { %215 = vmatprep.subr.mxu0 %v292_v1 }
  0x21   :  { %216 = vmatpush3.msra.mxu0 %v52_v13 }
  0x22   :  { %217 = vmatprep.subr.mxu0 %v292_v1 }
  0x23   :  { %218 = vmatpush3.msra.mxu0 %v51_v14 }
  0x24   :  { %219 = vmatprep.subr.mxu0 %v292_v1 }
  0x25   :  { %220 = vmatpush3.msra.mxu0 %v50_v15 }
  0x26   :  { %221 = vmatprep.subr.mxu0 %v292_v1 }
  0x27   :  { %222 = vmatpush3.msra.mxu0 %v49_v16 }
  0x28   :  { %223 = vmatprep.subr.mxu0 %v292_v1 }
  0x29   :  { %224 = vmatpush3.msra.mxu0 %v48_v17 }
  0x2a   :  { %225 = vmatprep.subr.mxu0 %v292_v1 }
  0x2b   :  { %226 = vmatpush3.msra.mxu0 %v47_v18 }
  0x2c   :  { %227 = vmatprep.subr.mxu0 %v292_v1 }
  0x2d   :  { %228 = vmatpush3.msra.mxu0 %v46_v19 }
  0x2e   :  { %229 = vmatprep.subr.mxu0 %v292_v1 }
  0x2f   :  { %230 = vmatpush3.msra.mxu0 %v45_v20 }
  0x8c   :  { %v41_v23 = vpop.permute.xlu0 %40 }
  0x8d   :  { %vm42_vm2 = vcmp.eq.s32.totalorder %v38_v22, %v41_v23  ;;  %v159_v30 = vpop.permute.xlu1 %158 }
  0x8e   :  { %232 = vmatmul.mubr.msk.f32.vlgmr.msra.gmra.mxu0 %vm42_vm2, %v294_v24  ;;  %vm160_vm3 = vcmp.eq.s32.totalorder %v159_v30, 1 }
  0x90   :  { %v141_v26 = vpop.permute.xlu0 %140 }
  0x91   :  { %v143_v27 = vmul.f32 %v180_v25, %v141_v26 }
  0x93   :  { %v151_v29 = vadd.f32 %v181_v28, %v143_v27 }
  0x95   :  { %v153_v32 = vmul.f32 0.5, %v151_v29 }
 0x14e   :  { %v127_v31 = vpop.f32.mrf.mxu0 }
 0x14f   :  { %v152_v33 = vmul.f32 0.5, %v127_v31 }
 0x150   :  { %v233_v34 = vpop.f32.mrf.mxu0 }
 0x151   :  { %v154_v35 = vadd.f32 %v153_v32, %v152_v33 }
 0x153   :  { %v161_v36 = vsel %vm160_vm3, %v154_v35, 0.0 }
 0x154   :  { %162 = vst [vmem:[#allocation5] sm:$0xff] %v161_v36 }
 0x155   :  { %275 = shalt.err (!%p272_p9)
}
 0x156   :  { %172 = dma.vmem_to_hbm [thread:$0]  %s170_s6, 128, %s349_s5, [#allocation4]  }
 0x157   :  { %286 = dma.done.wait [#allocation4], 128  }
 0x158   :  { %287 = vsyncadd [#allocation4], 4294967168 }
 0x159   :  { %176 = vsyncpa [#allocation3], 1 }
 0x15a   :  { %177 = vsyncpa [#allocation4], 1 }

</bundles_post_ra>
